<compile_context>
chip_gen: v5e
topology: v5e:2x2
jax: 0.10.0
libtpu: 0.0.40
codegen_flags: <defaults>
</compile_context>

<pallas_src>
import jax
import jax.numpy as jnp
from jax.experimental import pallas as pl
from jax.experimental.pallas import tpu as pltpu

_LANE = 128
_SUB = 16            # sublane multiple for bf16-packed batch tiles
_NEG_INF = -1e30
_BN_EPS = 1e-5


def _round_up(n, m):
    return ((n + m - 1) // m) * m


def _pad2d(a, rows, cols, fill=0.0):
    r, c = a.shape
    return jnp.pad(a, ((0, rows - r), (0, cols - c)), constant_values=fill)


def _mlp_kernel(x_ref,
                w1_ref, b1_ref,
                w2_ref, b2_ref,
                w3_ref, b3_ref,
                w4_ref, b4_ref,
                o_ref):
    # x tile arrives as bf16; MXU accumulates in f32; bias/ReLU/softmax stay f32.
    x = x_ref[...]

    h1 = jnp.dot(x, w1_ref[...], preferred_element_type=jnp.float32) + b1_ref[...]
    h1 = jnp.maximum(h1, 0.0)          # dropout: identity in eval mode

    h2 = jnp.dot(h1.astype(jnp.bfloat16), w2_ref[...],
                 preferred_element_type=jnp.float32) + b2_ref[...]
    h2 = jnp.maximum(h2, 0.0)

    h3 = jnp.dot(h2.astype(jnp.bfloat16), w3_ref[...],
                 preferred_element_type=jnp.float32) + b3_ref[...]
    h3 = jnp.maximum(h3, 0.0)

    logits = jnp.dot(h3.astype(jnp.bfloat16), w4_ref[...],
                     preferred_element_type=jnp.float32) + b4_ref[...]

    # softmax over the feature axis (f32); padded logit lanes carry a -1e30 bias,
    # so exp() underflows to exactly 0 and they contribute nothing to the denom.
    m = jnp.max(logits, axis=1, keepdims=True)
    e = jnp.exp(logits - m)
    denom = jnp.sum(e, axis=1, keepdims=True)
    o_ref[...] = (e * pl.reciprocal(denom, approx=True)).astype(o_ref.dtype)


def neural_network_forward(x, params, *, pre_norm: bool, tile_b: int = 2048):
    """Full MLP forward pass (eval mode) inside one batch-tiled Pallas kernel.

    x: (batch, input_dim) float32
    params: dict with bn_{gamma,beta,mean,var} of shape (1, input_dim) and
            w{1..4} of shape (in, out), b{1..4} of shape (1, out).
    """
    batch, input_dim = x.shape
    out_dim = params["w4"].shape[1]

    # ---- fold eval-mode BatchNorm into layer 1 (host-side precompute) ----
    w1 = params["w1"].astype(jnp.float32)
    b1 = params["b1"].astype(jnp.float32)
    if pre_norm:
        scale = params["bn_gamma"] * jax.lax.rsqrt(params["bn_var"] + _BN_EPS)  # (1, in)
        shift = params["bn_beta"] - params["bn_mean"] * scale                   # (1, in)
        w1 = w1 * scale[0][:, None]
        b1 = b1 + shift @ params["w1"]

    # ---- pad hidden/output feature dims to 128 lanes (input dim stays as-is) ----
    h1_p = _round_up(params["w1"].shape[1], _LANE)
    h2_p = _round_up(params["w2"].shape[1], _LANE)
    h3_p = _round_up(params["w3"].shape[1], _LANE)
    out_p = _round_up(out_dim, _LANE)

    w1p = _pad2d(w1, input_dim, h1_p).astype(jnp.bfloat16)          # (in, h1_p)
    w2p = _pad2d(params["w2"], h1_p, h2_p).astype(jnp.bfloat16)
    w3p = _pad2d(params["w3"], h2_p, h3_p).astype(jnp.bfloat16)
    w4p = _pad2d(params["w4"], h3_p, out_p).astype(jnp.bfloat16)
    b1p = _pad2d(b1, 1, h1_p).astype(jnp.float32)
    b2p = _pad2d(params["b2"], 1, h2_p).astype(jnp.float32)
    b3p = _pad2d(params["b3"], 1, h3_p).astype(jnp.float32)
    # padded logit lanes get a huge negative bias so softmax assigns them exactly 0
    b4p = _pad2d(params["b4"], 1, out_p, fill=_NEG_INF).astype(jnp.float32)

    # ---- batch tiling: big tiles (mem-bound + amortize ~0.35us/step), but always
    #      try for >= 2 tiles so v7x's second TensorCore isn't idle ----
    batch_r = _round_up(batch, _SUB)
    req = _round_up(max(min(tile_b, batch_r), _SUB), _SUB)
    num_tiles = -(-batch_r // req)                       # ceil div
    if num_tiles == 1 and batch_r >= 2 * _SUB:
        num_tiles = 2
    tile_b = _round_up(-(-batch_r // num_tiles), _SUB)
    batch_p = tile_b * num_tiles

    # bf16 input: cast fused into the pad (halves x's HBM read per step)
    xp = jnp.pad(x.astype(jnp.bfloat16), ((0, batch_p - batch), (0, 0)))

    x_spec = pl.BlockSpec((tile_b, input_dim), lambda i: (i, 0))
    o_spec = pl.BlockSpec((tile_b, out_p), lambda i: (i, 0))

    def _resident(shape):
        # whole array, same block index every grid step -> stays VMEM resident
        # (optionally pipeline_mode=pl.Buffered(1) to drop the 2nd buffer; ~130 KiB)
        return pl.BlockSpec(shape, lambda i: (0, 0))

    in_specs = [
        x_spec,
        _resident(w1p.shape), _resident(b1p.shape),
        _resident(w2p.shape), _resident(b2p.shape),
        _resident(w3p.shape), _resident(b3p.shape),
        _resident(w4p.shape), _resident(b4p.shape),
    ]

    weight_bytes = 2 * (input_dim * h1_p + h1_p * h2_p + h2_p * h3_p + h3_p * out_p)
    bias_bytes = 4 * (h1_p + h2_p + h3_p + out_p)
    flops = 2 * batch_p * (input_dim * h1_p + h1_p * h2_p + h2_p * h3_p + h3_p * out_p)
    transcendentals = batch_p * (out_p + 1)          # exp per logit + recip per row
    bytes_accessed = batch_p * (input_dim + out_p) * 2 + weight_bytes + bias_bytes

    out_padded = pl.pallas_call(
        _mlp_kernel,
        out_shape=jax.ShapeDtypeStruct((batch_p, out_p), jnp.bfloat16),
        grid=(num_tiles,),
        in_specs=in_specs,
        out_specs=o_spec,
        compiler_params=pltpu.CompilerParams(
            dimension_semantics=("parallel",),
            vmem_limit_bytes=32 * 1024 * 1024),
        cost_estimate=pl.CostEstimate(
            flops=int(flops),
            transcendentals=int(transcendentals),
            bytes_accessed=int(bytes_accessed)),
    )(xp, w1p, b1p, w2p, b2p, w3p, b3p, w4p, b4p)

    # slice back the real rows/classes; cast to f32 for the consumer
    return out_padded[:batch, :out_dim].astype(jnp.float32)


def init_params(key, input_dim, layer1, layer2, layer3, output_dim):
    """Deterministic parameter init (uniform ~ PyTorch Linear default ranges)."""
    def linear(k, fan_in, fan_out):
        kw, kb = jax.random.split(k)
        bound = 1.0 / jnp.sqrt(fan_in)
        w = jax.random.uniform(kw, (fan_in, fan_out), jnp.float32, -bound, bound)
        b = jax.random.uniform(kb, (1, fan_out), jnp.float32, -bound, bound)
        return w, b

    k1, k2, k3, k4, kg, kb, km, kv = jax.random.split(key, 8)
    w1, b1 = linear(k1, input_dim, layer1)
    w2, b2 = linear(k2, layer1, layer2)
    w3, b3 = linear(k3, layer2, layer3)
    w4, b4 = linear(k4, layer3, output_dim)

    return {
        # non-trivial BN stats (as if trained) so the BN-fold path is exercised
        "bn_gamma": jax.random.uniform(kg, (1, input_dim), jnp.float32, 0.5, 1.5),
        "bn_beta": 0.1 * jax.random.normal(kb, (1, input_dim), jnp.float32),
        "bn_mean": 0.1 * jax.random.normal(km, (1, input_dim), jnp.float32),
        "bn_var": jax.random.uniform(kv, (1, input_dim), jnp.float32, 0.5, 1.5),
        "w1": w1, "b1": b1,
        "w2": w2, "b2": b2,
        "w3": w3, "b3": b3,
        "w4": w4, "b4": b4,
    }


def reference_forward(x, params, *, pre_norm: bool):
    """Pure-JAX f32 reference matching the PyTorch eval-mode forward."""
    if pre_norm:
        x = (x - params["bn_mean"]) * jax.lax.rsqrt(params["bn_var"] + _BN_EPS) \
            * params["bn_gamma"] + params["bn_beta"]
    h = jnp.maximum(x @ params["w1"] + params["b1"], 0.0)
    h = jnp.maximum(h @ params["w2"] + params["b2"], 0.0)
    h = jnp.maximum(h @ params["w3"] + params["b3"], 0.0)
    logits = h @ params["w4"] + params["b4"]
    return jax.nn.softmax(logits, axis=1)


if __name__ == "__main__":
    # Small shapes consistent with the module's (batch, input_dim) contract.
    batch, input_dim = 8, 32
    layer1, layer2, layer3, output_dim = 64, 64, 32, 8
    dp = 0.3           # dropout prob (identity in eval mode)
    pre_norm = True

    key = jax.random.PRNGKey(0)
    kx, kp = jax.random.split(key)
    x = jax.random.normal(kx, (batch, input_dim), jnp.float32)
    params = init_params(kp, input_dim, layer1, layer2, layer3, output_dim)

    out = neural_network_forward(x, params, pre_norm=pre_norm)
    out = jax.block_until_ready(out)

    ref = reference_forward(x, params, pre_norm=pre_norm)
    assert out.shape == (batch, output_dim)
    # Tolerance accounts for bf16 matmul operands / bf16 output store + EUP approx
    # reciprocal (kernel accumulates in f32; reference is pure f32).
    assert jnp.allclose(out, ref, atol=2e-2, rtol=2e-2), "mismatch vs reference"
    # rows of softmax output sum to ~1 (bf16 output + approx reciprocal -> loosened)
    assert jnp.allclose(jnp.sum(out, axis=1), 1.0, atol=2e-2)

    print("KERNEL_OK")
</pallas_src>

<mosaic_0001>
module attributes {stable_mosaic.version = 11 : i64} {
  func.func @_mlp_kernel(%arg0: i32, %arg1: memref<16x32xbf16, #tpu.memory_space<vmem>>, %arg2: memref<32x128xbf16, #tpu.memory_space<vmem>>, %arg3: memref<1x128xf32, #tpu.memory_space<vmem>>, %arg4: memref<128x128xbf16, #tpu.memory_space<vmem>>, %arg5: memref<1x128xf32, #tpu.memory_space<vmem>>, %arg6: memref<128x128xbf16, #tpu.memory_space<vmem>>, %arg7: memref<1x128xf32, #tpu.memory_space<vmem>>, %arg8: memref<128x128xbf16, #tpu.memory_space<vmem>>, %arg9: memref<1x128xf32, #tpu.memory_space<vmem>>, %arg10: memref<16x128xbf16, #tpu.memory_space<vmem>>) attributes {dimension_semantics = [#tpu.dimension_semantics<parallel>], iteration_bounds = array<i64: 1>, scalar_prefetch = 0 : i64, scratch_operands = 0 : i64, tpu.core_type = #tpu.core_type<tc>, window_params = [{transform_indices = @transform_0, window_bounds = array<i64: 16, 32>}, {pipeline_mode = #tpu.pipeline_mode<synchronous>, transform_indices = @transform_1, window_bounds = array<i64: 32, 128>}, {pipeline_mode = #tpu.pipeline_mode<synchronous>, transform_indices = @transform_2, window_bounds = array<i64: 1, 128>}, {pipeline_mode = #tpu.pipeline_mode<synchronous>, transform_indices = @transform_3, window_bounds = array<i64: 128, 128>}, {pipeline_mode = #tpu.pipeline_mode<synchronous>, transform_indices = @transform_4, window_bounds = array<i64: 1, 128>}, {pipeline_mode = #tpu.pipeline_mode<synchronous>, transform_indices = @transform_5, window_bounds = array<i64: 128, 128>}, {pipeline_mode = #tpu.pipeline_mode<synchronous>, transform_indices = @transform_6, window_bounds = array<i64: 1, 128>}, {pipeline_mode = #tpu.pipeline_mode<synchronous>, transform_indices = @transform_7, window_bounds = array<i64: 128, 128>}, {pipeline_mode = #tpu.pipeline_mode<synchronous>, transform_indices = @transform_8, window_bounds = array<i64: 1, 128>}, {transform_indices = @transform_9, window_bounds = array<i64: 16, 128>}]} {
    %c0 = arith.constant 0 : index
    %c0_0 = arith.constant 0 : index
    %0 = vector.load %arg1[%c0, %c0_0] : memref<16x32xbf16, #tpu.memory_space<vmem>>, vector<16x32xbf16>
    %c0_1 = arith.constant 0 : index
    %c0_2 = arith.constant 0 : index
    %1 = vector.load %arg2[%c0_1, %c0_2] : memref<32x128xbf16, #tpu.memory_space<vmem>>, vector<32x128xbf16>
    %cst = arith.constant dense<0.000000e+00> : vector<16x128xf32>
    %2 = tpu.matmul %0, %1, %cst {dimension_numbers = #tpu.dot_dimension_numbers<[1], [0], [0], [1], [0, 0, 1, 1], [], []>} : vector<16x32xbf16>, vector<32x128xbf16>, vector<16x128xf32> -> vector<16x128xf32>
    %c0_3 = arith.constant 0 : index
    %c0_4 = arith.constant 0 : index
    %3 = vector.load %arg3[%c0_3, %c0_4] : memref<1x128xf32, #tpu.memory_space<vmem>>, vector<1x128xf32>
    %4 = vector.broadcast %3 : vector<1x128xf32> to vector<16x128xf32>
    %5 = arith.addf %2, %4 : vector<16x128xf32>
    %cst_5 = arith.constant 0.000000e+00 : f32
    %6 = vector.broadcast %cst_5 : f32 to vector<16x128xf32>
    %7 = arith.maximumf %5, %6 : vector<16x128xf32>
    %8 = arith.truncf %7 : vector<16x128xf32> to vector<16x128xbf16>
    %c0_6 = arith.constant 0 : index
    %c0_7 = arith.constant 0 : index
    %9 = vector.load %arg4[%c0_6, %c0_7] : memref<128x128xbf16, #tpu.memory_space<vmem>>, vector<128x128xbf16>
    %cst_8 = arith.constant dense<0.000000e+00> : vector<16x128xf32>
    %10 = tpu.matmul %8, %9, %cst_8 {dimension_numbers = #tpu.dot_dimension_numbers<[1], [0], [0], [1], [0, 0, 1, 1], [], []>} : vector<16x128xbf16>, vector<128x128xbf16>, vector<16x128xf32> -> vector<16x128xf32>
    %c0_9 = arith.constant 0 : index
    %c0_10 = arith.constant 0 : index
    %11 = vector.load %arg5[%c0_9, %c0_10] : memref<1x128xf32, #tpu.memory_space<vmem>>, vector<1x128xf32>
    %12 = vector.broadcast %11 : vector<1x128xf32> to vector<16x128xf32>
    %13 = arith.addf %10, %12 : vector<16x128xf32>
    %cst_11 = arith.constant 0.000000e+00 : f32
    %14 = vector.broadcast %cst_11 : f32 to vector<16x128xf32>
    %15 = arith.maximumf %13, %14 : vector<16x128xf32>
    %16 = arith.truncf %15 : vector<16x128xf32> to vector<16x128xbf16>
    %c0_12 = arith.constant 0 : index
    %c0_13 = arith.constant 0 : index
    %17 = vector.load %arg6[%c0_12, %c0_13] : memref<128x128xbf16, #tpu.memory_space<vmem>>, vector<128x128xbf16>
    %cst_14 = arith.constant dense<0.000000e+00> : vector<16x128xf32>
    %18 = tpu.matmul %16, %17, %cst_14 {dimension_numbers = #tpu.dot_dimension_numbers<[1], [0], [0], [1], [0, 0, 1, 1], [], []>} : vector<16x128xbf16>, vector<128x128xbf16>, vector<16x128xf32> -> vector<16x128xf32>
    %c0_15 = arith.constant 0 : index
    %c0_16 = arith.constant 0 : index
    %19 = vector.load %arg7[%c0_15, %c0_16] : memref<1x128xf32, #tpu.memory_space<vmem>>, vector<1x128xf32>
    %20 = vector.broadcast %19 : vector<1x128xf32> to vector<16x128xf32>
    %21 = arith.addf %18, %20 : vector<16x128xf32>
    %cst_17 = arith.constant 0.000000e+00 : f32
    %22 = vector.broadcast %cst_17 : f32 to vector<16x128xf32>
    %23 = arith.maximumf %21, %22 : vector<16x128xf32>
    %24 = arith.truncf %23 : vector<16x128xf32> to vector<16x128xbf16>
    %c0_18 = arith.constant 0 : index
    %c0_19 = arith.constant 0 : index
    %25 = vector.load %arg8[%c0_18, %c0_19] : memref<128x128xbf16, #tpu.memory_space<vmem>>, vector<128x128xbf16>
    %cst_20 = arith.constant dense<0.000000e+00> : vector<16x128xf32>
    %26 = tpu.matmul %24, %25, %cst_20 {dimension_numbers = #tpu.dot_dimension_numbers<[1], [0], [0], [1], [0, 0, 1, 1], [], []>} : vector<16x128xbf16>, vector<128x128xbf16>, vector<16x128xf32> -> vector<16x128xf32>
    %c0_21 = arith.constant 0 : index
    %c0_22 = arith.constant 0 : index
    %27 = vector.load %arg9[%c0_21, %c0_22] : memref<1x128xf32, #tpu.memory_space<vmem>>, vector<1x128xf32>
    %28 = vector.broadcast %27 : vector<1x128xf32> to vector<16x128xf32>
    %29 = arith.addf %26, %28 : vector<16x128xf32>
    %cst_23 = arith.constant dense<0xFF800000> : vector<16xf32>
    %30 = vector.multi_reduction <maximumf>, %29, %cst_23 [1] : vector<16x128xf32> to vector<16xf32>
    %31 = vector.shape_cast %30 : vector<16xf32> to vector<16x1xf32>
    %32 = vector.broadcast %31 : vector<16x1xf32> to vector<16x128xf32>
    %33 = arith.subf %29, %32 : vector<16x128xf32>
    %34 = math.exp %33 : vector<16x128xf32>
    %cst_24 = arith.constant dense<0.000000e+00> : vector<16xf32>
    %35 = vector.multi_reduction <add>, %34, %cst_24 [1] : vector<16x128xf32> to vector<16xf32>
    %36 = vector.shape_cast %35 : vector<16xf32> to vector<16x1xf32>
    %37 = tpu.reciprocal %36 {approx = true} : vector<16x1xf32> -> vector<16x1xf32>
    %38 = vector.broadcast %37 : vector<16x1xf32> to vector<16x128xf32>
    %39 = arith.mulf %34, %38 : vector<16x128xf32>
    %40 = arith.truncf %39 : vector<16x128xf32> to vector<16x128xbf16>
    %c0_25 = arith.constant 0 : index
    %c0_26 = arith.constant 0 : index
    %41 = vector.load %arg10[%c0_25, %c0_26] : memref<16x128xbf16, #tpu.memory_space<vmem>>, vector<16x128xbf16>
    tpu.vector_store %arg10[%c0_25, %c0_26], %40 {strides = array<i32>} : memref<16x128xbf16, #tpu.memory_space<vmem>>, vector<16x128xbf16>,
    return
  }
  func.func @transform_0(%arg0: i32) -> (i32, i32) {
    %c0_i32 = arith.constant 0 : i32
    %c0_i32_0 = arith.constant 0 : i32
    return %arg0, %c0_i32 : i32, i32
  }
  func.func @transform_1(%arg0: i32) -> (i32, i32) {
    %c0_i32 = arith.constant 0 : i32
    %c0_i32_0 = arith.constant 0 : i32
    %c0_i32_1 = arith.constant 0 : i32
    return %c0_i32, %c0_i32_0 : i32, i32
  }
  func.func @transform_2(%arg0: i32) -> (i32, i32) {
    %c0_i32 = arith.constant 0 : i32
    %c0_i32_0 = arith.constant 0 : i32
    %c0_i32_1 = arith.constant 0 : i32
    return %c0_i32, %c0_i32_0 : i32, i32
  }
  func.func @transform_3(%arg0: i32) -> (i32, i32) {
    %c0_i32 = arith.constant 0 : i32
    %c0_i32_0 = arith.constant 0 : i32
    %c0_i32_1 = arith.constant 0 : i32
    return %c0_i32, %c0_i32_0 : i32, i32
  }
  func.func @transform_4(%arg0: i32) -> (i32, i32) {
    %c0_i32 = arith.constant 0 : i32
    %c0_i32_0 = arith.constant 0 : i32
    %c0_i32_1 = arith.constant 0 : i32
    return %c0_i32, %c0_i32_0 : i32, i32
  }
  func.func @transform_5(%arg0: i32) -> (i32, i32) {
    %c0_i32 = arith.constant 0 : i32
    %c0_i32_0 = arith.constant 0 : i32
    %c0_i32_1 = arith.constant 0 : i32
    return %c0_i32, %c0_i32_0 : i32, i32
  }
  func.func @transform_6(%arg0: i32) -> (i32, i32) {
    %c0_i32 = arith.constant 0 : i32
    %c0_i32_0 = arith.constant 0 : i32
    %c0_i32_1 = arith.constant 0 : i32
    return %c0_i32, %c0_i32_0 : i32, i32
  }
  func.func @transform_7(%arg0: i32) -> (i32, i32) {
    %c0_i32 = arith.constant 0 : i32
    %c0_i32_0 = arith.constant 0 : i32
    %c0_i32_1 = arith.constant 0 : i32
    return %c0_i32, %c0_i32_0 : i32, i32
  }
  func.func @transform_8(%arg0: i32) -> (i32, i32) {
    %c0_i32 = arith.constant 0 : i32
    %c0_i32_0 = arith.constant 0 : i32
    %c0_i32_1 = arith.constant 0 : i32
    return %c0_i32, %c0_i32_0 : i32, i32
  }
  func.func @transform_9(%arg0: i32) -> (i32, i32) {
    %c0_i32 = arith.constant 0 : i32
    %c0_i32_0 = arith.constant 0 : i32
    return %arg0, %c0_i32 : i32, i32
  }
}

</mosaic_0001>

<bundles_post_ra>
// kernel: tpu_custom_call.1
= control target key start
LH: loop header
LB: loop body
LE: loop exit
PB: predicated region body
PF: predicated region fallthrough
CT: control target
= control target key end

     0   :  { %14 = vsyncpa [#allocation3], 0  ;;  %s874_s0 = inlined_call_operand.hbm [shape: bf16[16,32], index: 0, kind: input, shape index: {}]   ;;  %s875_s1 = inlined_call_operand.hbm [shape: bf16[32,128], index: 1, kind: input, shape index: {}]   ;;  %s876_s2 = inlined_call_operand.vmem [shape: f32[1,128], index: 2, kind: input, shape index: {}]   ;;  %s877_s3 = inlined_call_operand.hbm [shape: bf16[128,128], index: 3, kind: input, shape index: {}]   ;;  %s878_s4 = inlined_call_operand.vmem [shape: f32[1,128], index: 4, kind: input, shape index: {}]   ;;  %s879_s5 = inlined_call_operand.hbm [shape: bf16[128,128], index: 5, kind: input, shape index: {}]   ;;  %s880_s6 = inlined_call_operand.vmem [shape: f32[1,128], index: 6, kind: input, shape index: {}]   ;;  %s881_s7 = inlined_call_operand.hbm [shape: bf16[128,128], index: 7, kind: input, shape index: {}]   ;;  %s882_s8 = inlined_call_operand.vmem [shape: f32[1,128], index: 8, kind: input, shape index: {}]   ;;  %s883_s9 = inlined_call_operand.hbm [shape: bf16[16,128], index: 9, kind: output, shape index: {}]  }
   0x1   :  { %15 = vsyncpa [#allocation6], 0 }
   0x2   :  { %16 = vsyncpa [#allocation9], 0 }
   0x3   :  { %17 = vsyncpa [#allocation4], 0  ;;  %s35_s11 = sshll.u32 %s875_s1, 4  ;;  %s768_s12 = smov [#allocation5]   ;;  %s36_s11 = int_to_ptr.hbm [resolvable:$true] %s35_s11 }
   0x4   :  { %s37_s13 = sshll.u32 %s768_s12, 4  ;;  %s65_s16 = sshll.u32 %s879_s5, 4  ;;  %s38_s13 = int_to_ptr.vmem [resolvable:$true] %s37_s13  ;;  %s66_s16 = int_to_ptr.hbm [resolvable:$true] %s65_s16 }
   0x5   :  { %s769_s17 = smov 64   ;;  %s770_s18 = smov 4  }
   0x6   :  { %43 = dma.hbm_to_vmem [thread:$0]  %s36_s11, 256, %s38_s13, [#allocation6], %s769_s17, %s769_s17, %s770_s18  }
   0x7   :  { %s771_s19 = smov [#allocation8]   ;;  %s22_s1 = sshll.u32 %s874_s0, 4  ;;  %s23_s1 = int_to_ptr.hbm [resolvable:$true] %s22_s1 }
   0x8   :  { %s67_s20 = sshll.u32 %s771_s19, 4  ;;  %s50_s24 = sshll.u32 %s877_s3, 4  ;;  %s68_s20 = int_to_ptr.vmem [resolvable:$true] %s67_s20  ;;  %s51_s24 = int_to_ptr.hbm [resolvable:$true] %s50_s24 }
   0x9   :  { %73 = dma.hbm_to_vmem [thread:$0]  %s66_s16, 1024, %s68_s20, [#allocation9], %s769_s17, %s769_s17, %s770_s18  }
   0xa   :  { %s772_s25 = smov [#allocation2]   ;;  %s773_s27 = smov [#allocation7]  }
   0xb   :  { %s24_s26 = sshll.u32 %s772_s25, 4  ;;  %s52_s0 = sshll.u32 %s773_s27, 4  ;;  %s25_s26 = int_to_ptr.vmem [resolvable:$true] %s24_s26  ;;  %s53_s0 = int_to_ptr.vmem [resolvable:$true] %s52_s0 }
   0xc   :  { %30 = dma.hbm_to_vmem [thread:$0]  %s23_s1, 128, %s25_s26, [#allocation3], %s769_s17, %s769_s17, %s770_s18  }
   0xd   :  { %s80_s30 = sshll.u32 %s881_s7, 4  ;;  %s774_s3 = smov [#allocation10]   ;;  %s81_s30 = int_to_ptr.hbm [resolvable:$true] %s80_s30 }
   0xe   :  { %58 = dma.hbm_to_vmem [thread:$0]  %s51_s24, 1024, %s53_s0, [#allocation6], %s769_s17, %s769_s17, %s770_s18  }
   0xf   :  { %s82_s10 = sshll.u32 %s774_s3, 4  ;;  %s83_s10 = int_to_ptr.vmem [resolvable:$true] %s82_s10 }
  0x10   :  { %88 = dma.hbm_to_vmem [thread:$0]  %s81_s30, 1024, %s83_s10, [#allocation9], %s769_s17, %s769_s17, %s770_s18  }
  0x11   :  { %760 = dma.done.wait [#allocation3], 128  }
  0x12   :  { %761 = vsyncadd [#allocation3], 4294967168 }
  0x13   :  { %762 = dma.done.wait [#allocation6], 1280  }
  0x14   :  { %763 = vsyncadd [#allocation6], 4294966016 }
  0x15   :  { %764 = dma.done.wait [#allocation9], 2048  }
  0x16   :  { %765 = vsyncadd [#allocation9], 4294965248  ;;  %v566_v0 = vld [vmem:[#allocation5 + $0x8] sm:$0xff]  ;;  %v565_v2 = vld [vmem:[#allocation5] sm:$0xff]  ;;  %vm139_vm0 = vcmask 261120   ;;  %s440_s20 = sshll.u32 %s883_s9, 4  ;;  %s441_s20 = int_to_ptr.hbm [resolvable:$true] %s440_s20 }
  0x17   :  { %v574_v1 = vld [vmem:[#allocation7 + $0x38] sm:$0xff]  ;;  %149 = vmatpush.bf16.msra.mxu0 %v566_v0  ;;  %v573_v3 = vld [vmem:[#allocation7 + $0x30] sm:$0xff]  ;;  %v564_v4 = vld [vmem:[#allocation2] sm:$0xff] }
  0x18   :  { %228 = vmatpush.bf16.msra.mxu1 %v574_v1  ;;  %v572_v5 = vld [vmem:[#allocation7 + $0x28] sm:$0xff]  ;;  %v571_v6 = vld [vmem:[#allocation7 + $0x20] sm:$0xff]  ;;  %v570_v7 = vld [vmem:[#allocation7 + $0x18] sm:$0xff] }
  0x19   :  { %v569_v8 = vld [vmem:[#allocation7 + $0x10] sm:$0xff]  ;;  %v568_v9 = vld [vmem:[#allocation7 + $0x8] sm:$0xff]  ;;  %v567_v10 = vld [vmem:[#allocation7] sm:$0xff] }
  0x1a   :  { %v582_v11 = vld [vmem:[#allocation8 + $0x38] sm:$0xff]  ;;  %v581_v12 = vld [vmem:[#allocation8 + $0x30] sm:$0xff]  ;;  %v580_v13 = vld [vmem:[#allocation8 + $0x28] sm:$0xff] }
  0x1b   :  { %150 = vmatpush.bf16.msra.mxu0 %v565_v2  ;;  %313 = vmatpush.bf16.msra.mxu2 %v582_v11  ;;  %v579_v14 = vld [vmem:[#allocation8 + $0x20] sm:$0xff]  ;;  %v604_v16 = vld [vmem:[%s876_s2] ss:$0 sm:$0xff]  ;;  %v578_v23 = vld [vmem:[#allocation8 + $0x18] sm:$0xff] }
  0x1c   :  { %229 = vmatpush.bf16.msra.mxu1 %v573_v3  ;;  %v577_v24 = vld [vmem:[#allocation8 + $0x10] sm:$0xff]  ;;  %v576_v25 = vld [vmem:[#allocation8 + $0x8] sm:$0xff]  ;;  %v575_v26 = vld [vmem:[#allocation8] sm:$0xff] }
  0x1d   :  { %v590_v27 = vld [vmem:[#allocation10 + $0x38] sm:$0xff]  ;;  %v589_v28 = vld [vmem:[#allocation10 + $0x30] sm:$0xff]  ;;  %v588_v29 = vld [vmem:[#allocation10 + $0x28] sm:$0xff] }
  0x1e   :  { %467 = vmatmul.msk.bf16.vlgmr.msra.gmra.mxu0 %vm139_vm0, %v564_v4  ;;  %398 = vmatpush.bf16.msra.mxu3 %v590_v27  ;;  %v587_v30 = vld [vmem:[#allocation10 + $0x20] sm:$0xff]  ;;  %v605_v32 = vld [vmem:[%s878_s4] ss:$0 sm:$0xff]  ;;  %v586_v39 = vld [vmem:[#allocation10 + $0x18] sm:$0xff] }
  0x1f   :  { %314 = vmatpush.bf16.msra.mxu2 %v581_v12  ;;  %v585_v40 = vld [vmem:[#allocation10 + $0x10] sm:$0xff]  ;;  %v584_v41 = vld [vmem:[#allocation10 + $0x8] sm:$0xff]  ;;  %v583_v42 = vld [vmem:[#allocation10] sm:$0xff] }
  0x20   :  { %230 = vmatpush.bf16.msra.mxu1 %v572_v5  ;;  %v606_v44 = vld [vmem:[%s880_s6] ss:$0 sm:$0xff]  ;;  %s775_s6 = smov [#allocation11]  }
  0x21   :  { %v607_v51 = vld [vmem:[%s882_s8] ss:$0 sm:$0xff]  ;;  %s438_s8 = sshll.u32 %s775_s6, 4  ;;  %s439_s8 = int_to_ptr.vmem [resolvable:$true] %s438_s8 }
  0x22   :  { %399 = vmatpush.bf16.msra.mxu3 %v589_v28 }
  0x23   :  { %315 = vmatpush.bf16.msra.mxu2 %v580_v13 }
  0x24   :  { %231 = vmatpush.bf16.msra.mxu1 %v571_v6 }
  0x26   :  { %400 = vmatpush.bf16.msra.mxu3 %v588_v29 }
  0x27   :  { %316 = vmatpush.bf16.msra.mxu2 %v579_v14 }
  0x28   :  { %232 = vmatpush.bf16.msra.mxu1 %v570_v7 }
  0x2a   :  { %401 = vmatpush.bf16.msra.mxu3 %v587_v30 }
  0x2b   :  { %317 = vmatpush.bf16.msra.mxu2 %v578_v23 }
  0x2c   :  { %233 = vmatpush.bf16.msra.mxu1 %v569_v8 }
  0x2e   :  { %402 = vmatpush.bf16.msra.mxu3 %v586_v39 }
  0x2f   :  { %318 = vmatpush.bf16.msra.mxu2 %v577_v24 }
  0x30   :  { %234 = vmatpush.bf16.msra.mxu1 %v568_v9 }
  0x32   :  { %403 = vmatpush.bf16.msra.mxu3 %v585_v40 }
  0x33   :  { %319 = vmatpush.bf16.msra.mxu2 %v576_v25 }
  0x34   :  { %235 = vmatpush.bf16.msra.mxu1 %v567_v10 }
  0x36   :  { %404 = vmatpush.bf16.msra.mxu3 %v584_v41 }
  0x37   :  { %320 = vmatpush.bf16.msra.mxu2 %v575_v26 }
  0x3a   :  { %405 = vmatpush.bf16.msra.mxu3 %v583_v42 }
  0x9b   :  { %v152_v15 = vpop.f32.mrf.mxu0 }
  0x9c   :  { %v153_v17 = vadd.f32 %v604_v16, %v152_v15 }
  0x9e   :  { %v157_v20 = vmax.f32 %v153_v17, 0.0 }
  0xa3   :  { %v154_v18 = vpop.f32.mrf.mxu0 }
  0xa4   :  { %v155_v19 = vadd.f32 %v604_v16, %v154_v18 }
  0xa6   :  { %v158_v21 = vmax.f32 %v155_v19, 0.0 }
  0xa8   :  { %v159_v22 = vpack.c.bf16 %v158_v21, %v157_v20 }
  0xaa   :  { %236 = vmatmul.bf16.vlgmr.msra.gmra.mxu1 %v159_v22 }
 0x127   :  { %v237_v31 = vpop.f32.mrf.mxu1 }
 0x128   :  { %v238_v33 = vadd.f32 %v605_v32, %v237_v31 }
 0x12a   :  { %v242_v36 = vmax.f32 %v238_v33, 0.0 }
 0x12f   :  { %v239_v34 = vpop.f32.mrf.mxu1 }
 0x130   :  { %v240_v35 = vadd.f32 %v605_v32, %v239_v34 }
 0x132   :  { %v243_v37 = vmax.f32 %v240_v35, 0.0 }
 0x134   :  { %v244_v38 = vpack.c.bf16 %v243_v37, %v242_v36 }
 0x136   :  { %321 = vmatmul.bf16.vlgmr.msra.gmra.mxu2 %v244_v38 }
 0x1b9   :  { %v322_v43 = vpop.f32.mrf.mxu2 }
 0x1ba   :  { %v323_v45 = vadd.f32 %v606_v44, %v322_v43 }
 0x1bc   :  { %v327_v48 = vmax.f32 %v323_v45, 0.0 }
 0x1c1   :  { %v324_v46 = vpop.f32.mrf.mxu2 }
 0x1c2   :  { %v325_v47 = vadd.f32 %v606_v44, %v324_v46 }
 0x1c4   :  { %v328_v49 = vmax.f32 %v325_v47, 0.0 }
 0x1c6   :  { %v329_v50 = vpack.c.bf16 %v328_v49, %v327_v48 }
 0x1c8   :  { %406 = vmatmul.bf16.vlgmr.msra.gmra.mxu3 %v329_v50 }
 0x24b   :  { %v407_v52 = vpop.f32.mrf.mxu3 }
 0x24c   :  { %v408_v53 = vadd.f32 %v607_v51, %v407_v52 }
 0x24e   :  { %412 = vmax.xlane.f32.xlu0 %v408_v53 }
 0x253   :  { %v409_v54 = vpop.f32.mrf.mxu3 }
 0x254   :  { %v410_v55 = vadd.f32 %v607_v51, %v409_v54 }
 0x256   :  { %414 = vmax.xlane.f32.xlu0 %v410_v55 }
 0x2c1   :  { %v413_v56 = vpop.xlane.xlu0 %412 }
 0x2c2   :  { %v416_v57 = vsub.f32 %v408_v53, %v413_v56 }
 0x2c4   :  { %v418_v58 = vmul.f32 1.442695, %v416_v57 }
 0x2c6   :  { %608 = vpow2.f32 %v418_v58 }
 0x2c9   :  { %v415_v59 = vpop.xlane.xlu0 %414 }
 0x2ca   :  { %v417_v60 = vsub.f32 %v410_v55, %v415_v59 }
 0x2cc   :  { %v609_v61 = vpop.eup %608  ;;  %v420_v62 = vmul.f32 1.442695, %v417_v60 }
 0x2cd   :  { %422 = vadd.xlane.f32.xlu1 %v609_v61 }
 0x2ce   :  { %610 = vpow2.f32 %v420_v62 }
 0x2d4   :  { %v611_v63 = vpop.eup %610 }
 0x2d5   :  { %424 = vadd.xlane.f32.xlu1 %v611_v63 }
 0x340   :  { %v423_v0 = vpop.xlane.xlu1 %422 }
 0x341   :  { %612 = vrcp.f32 %v423_v0 }
 0x347   :  { %v613_v2 = vpop.eup %612 }
 0x348   :  { %v425_v1 = vpop.xlane.xlu1 %424  ;;  %v428_v5 = vmul.f32 %v613_v2, %v609_v61 }
 0x349   :  { %614 = vrcp.f32 %v425_v1 }
 0x34f   :  { %v615_v3 = vpop.eup %614 }
 0x350   :  { %v429_v4 = vmul.f32 %v615_v3, %v611_v63 }
 0x352   :  { %v594_v6 = vpack.c.bf16 %v429_v4, %v428_v5 }
 0x354   :  { %595 = vst [vmem:[#allocation11] sm:$0xff] %v594_v6  }
 0x355   :  { %446 = dma.vmem_to_hbm [thread:$0]  %s439_s8, 128, %s441_s20, [#allocation4], %s769_s17, %s769_s17, %s770_s18  }
 0x356   :  { %766 = dma.done.wait [#allocation4], 128  }
 0x357   :  { %767 = vsyncadd [#allocation4], 4294967168 }
 0x358   :  { %451 = vsyncpa [#allocation3], 1 }
 0x359   :  { %452 = vsyncpa [#allocation6], 1 }
 0x35a   :  { %453 = vsyncpa [#allocation9], 1 }
 0x35b   :  { %454 = vsyncpa [#allocation4], 1 }

</bundles_post_ra>
